<compile_context>
chip_gen: v6e
topology: v6e:2x2x1
jax: 0.10.0
libtpu: 0.0.40
codegen_flags: <defaults>
</compile_context>

<pallas_src>
import functools

import jax
import jax.numpy as jnp
from jax.experimental import pallas as pl
from jax.experimental.pallas import tpu as pltpu


# ---------------------------------------------------------------------------
# Tile / VMEM sizing helpers
# ---------------------------------------------------------------------------
def _pick_hw_tile(hw, d, act_budget_bytes=4 << 20):
    """Largest 128-multiple divisor of HW whose (D, tile) f32 activation fits a
    few-MiB budget, so the x stream double-buffers cleanly on v5e/v6e/v7x."""
    target = max(128, (act_budget_bytes // (4 * d)) // 128 * 128)
    if hw <= target:
        return hw
    t = min(target, (hw // 128) * 128)
    while t >= 128:
        if hw % t == 0:
            return t
        t -= 128
    return hw  # no 128-aligned divisor: fall back to a single full-HW block


def _vmem_limit_bytes(c, t_hw, d, lc_pad):
    est = (2 * c * t_hw * 4              # x tile, double-buffered (f32)
           + d * c * 2 + d * 4           # feat_w (bf16) + feat_b (f32), resident
           + lc_pad * d * 2 + lc_pad * 4 # head_w (bf16) + head_b (f32), resident
           + 2 * lc_pad * 4              # head output block, double-buffered
           + d * 128 * 4                 # (D, 1) accumulator (lane-padded)
           + 2 * t_hw * d * 4)           # (D, t_hw) f32 activation + headroom
    return int(max(16 << 20, min(2 * est, 48 << 20)))


# ---------------------------------------------------------------------------
# Kernel 1 (multi_image == 1): 1x1-conv feats + relu + global-avg-pool + all
# label heads, fully fused.  Grid = (N images [parallel], HW tiles [arbitrary]).
#   x block      : (1, C, T_HW)   -- NCHW kept, HW on the lane axis (lane-dense)
#   feat_w       : (D, C)  bf16   -- resident
#   feat_b       : (D, 1)  f32
#   head_w       : (LC_pad, D) bf16, head_b: (LC_pad, 1) f32  (LC padded to 128)
#   out block    : (1, LC_pad, 1) f32
#   acc scratch  : (D, 1) f32     -- spatial sum accumulator
# ---------------------------------------------------------------------------
def make_feat_pool_heads_kernel(inv_hw):
    def kernel(x_ref, fw_ref, fb_ref, hw_ref, hb_ref, o_ref, acc_ref):
        k = pl.program_id(1)

        @pl.when(k == 0)
        def _init():
            acc_ref[...] = jnp.zeros_like(acc_ref)

        x = x_ref[0].astype(jnp.bfloat16)                    # (C, T_HW)
        y = jnp.dot(fw_ref[...], x,                          # (D, T_HW)
                    preferred_element_type=jnp.float32)      # f32 accumulation
        y = jnp.maximum(y + fb_ref[...], 0.0)                # bias + relu in f32
        acc_ref[...] += jnp.sum(y, axis=1, keepdims=True)    # partial spatial sum

        @pl.when(k == pl.num_programs(1) - 1)
        def _finalize():
            pooled = (acc_ref[...] * inv_hw).astype(jnp.bfloat16)   # (D, 1)
            o_ref[0] = (jnp.dot(hw_ref[...], pooled,
                                preferred_element_type=jnp.float32)
                        + hb_ref[...])                        # (LC_pad, 1)
    return kernel


# Kernel 1b (multi_image > 1): same body, but emits pooled features so the
# multi-image max-reduction can run before the heads.
def make_feat_pool_kernel(inv_hw):
    def kernel(x_ref, fw_ref, fb_ref, o_ref, acc_ref):
        k = pl.program_id(1)

        @pl.when(k == 0)
        def _init():
            acc_ref[...] = jnp.zeros_like(acc_ref)

        x = x_ref[0].astype(jnp.bfloat16)
        y = jnp.dot(fw_ref[...], x, preferred_element_type=jnp.float32)
        y = jnp.maximum(y + fb_ref[...], 0.0)
        acc_ref[...] += jnp.sum(y, axis=1, keepdims=True)

        @pl.when(k == pl.num_programs(1) - 1)
        def _finalize():
            o_ref[0] = acc_ref[...] * inv_hw                  # (D, 1) pooled
    return kernel


# Kernel 2 (only used when multi_image > 1): all label heads in one matmul.
def heads_kernel(x_ref, hw_ref, o_ref):
    o_ref[...] = jnp.dot(x_ref[...].astype(jnp.bfloat16), hw_ref[...].T,
                         preferred_element_type=jnp.float32)


# ---------------------------------------------------------------------------
# Forward
# ---------------------------------------------------------------------------
@functools.partial(jax.jit, static_argnames=("multi_image", "num_labels",
                                             "num_classes"))
def image_classification_forward(x_nchw, params, *, multi_image=1,
                                 num_labels=14, num_classes=3):
    # flatten_image: (B, M, C, H, W) -> (B*M, C, H, W)
    if multi_image > 1:
        x_nchw = x_nchw.reshape((-1,) + x_nchw.shape[2:])
    N, C, H, W = x_nchw.shape
    HW = H * W
    D = params["feat_w"].shape[0]
    LC = num_labels * num_classes
    LC_pad = params["head_w"].shape[0]

    # Keep NCHW; this is only a contiguous reshape (no transpose, no extra
    # HBM round trip of the activation tensor).
    x = x_nchw.reshape(N, C, HW)

    t_hw = _pick_hw_tile(HW, D)
    grid = (N, HW // t_hw)
    inv_hw = 1.0 / float(HW)

    cp = pltpu.CompilerParams(
        dimension_semantics=("parallel", "arbitrary"),
        vmem_limit_bytes=_vmem_limit_bytes(C, t_hw, D, LC_pad))

    x_spec = pl.BlockSpec((1, C, t_hw), lambda n, k: (n, 0, k))
    fw_spec = pl.BlockSpec((D, C), lambda n, k: (0, 0))
    fb_spec = pl.BlockSpec((D, 1), lambda n, k: (0, 0))

    if multi_image == 1:
        out = pl.pallas_call(
            make_feat_pool_heads_kernel(inv_hw),
            out_shape=jax.ShapeDtypeStruct((N, LC_pad, 1), jnp.float32),
            grid=grid,
            in_specs=[
                x_spec, fw_spec, fb_spec,
                pl.BlockSpec((LC_pad, D), lambda n, k: (0, 0)),
                pl.BlockSpec((LC_pad, 1), lambda n, k: (0, 0)),
            ],
            out_specs=pl.BlockSpec((1, LC_pad, 1), lambda n, k: (n, 0, 0)),
            scratch_shapes=[pltpu.VMEM((D, 1), jnp.float32)],
            compiler_params=cp,
        )(x, params["feat_w"], params["feat_b"],
          params["head_w"], params["head_b"])
        y = out[:, :LC, 0]                       # drop the lane padding
        B = N
    else:
        pooled = pl.pallas_call(
            make_feat_pool_kernel(inv_hw),
            out_shape=jax.ShapeDtypeStruct((N, D, 1), jnp.float32),
            grid=grid,
            in_specs=[x_spec, fw_spec, fb_spec],
            out_specs=pl.BlockSpec((1, D, 1), lambda n, k: (n, 0, 0)),
            scratch_shapes=[pltpu.VMEM((D, 1), jnp.float32)],
            compiler_params=cp,
        )(x, params["feat_w"], params["feat_b"])
        feats = pooled[:, :, 0]                  # torch.flatten(x, 1)
        # deflatten_image: max over the multi_image axis
        feats = feats.reshape(-1, multi_image, D).max(axis=1)
        B = feats.shape[0]
        y_pad = pl.pallas_call(
            heads_kernel,
            out_shape=jax.ShapeDtypeStruct((B, LC_pad), jnp.float32),
            in_specs=[pl.BlockSpec(memory_space=pltpu.MemorySpace.VMEM)] * 2,
            out_specs=pl.BlockSpec(memory_space=pltpu.MemorySpace.VMEM),
        )(feats, params["head_w"])
        y = y_pad[:, :LC] + params["head_b"][:LC, 0][None, :]

    # Dropout p=0.0 (module default) is the identity.
    # TODO(synk): stochastic dropout for p > 0 (train mode) not modeled.
    # (B, L*C) -> (B, L, C) -> (B, C, L)  == torch.cat([head_i(x).unsqueeze(2)], 2)
    return jnp.transpose(y.reshape(B, num_labels, num_classes), (0, 2, 1))


# ---------------------------------------------------------------------------
# Parameters (feat_w/head_w stored in PyTorch (out, in) layout, bf16 for MXU;
# head rows padded to a lane-dense 128)
# ---------------------------------------------------------------------------
def init_params(key, c_in, image_dim, num_labels, num_classes):
    k1, k2, k3, k4 = jax.random.split(key, 4)
    feat_w = 0.1 * jax.random.normal(k1, (image_dim, c_in), jnp.float32)
    feat_b = 0.1 * jax.random.normal(k2, (image_dim, 1), jnp.float32)
    # Per-label Linear(image_dim, num_classes); PyTorch weight layout is
    # (num_classes, image_dim) per head.  Stack rows in (label, class) order.
    w_labels = 0.1 * jax.random.normal(
        k3, (num_labels, num_classes, image_dim), jnp.float32)
    b_labels = 0.1 * jax.random.normal(
        k4, (num_labels, num_classes), jnp.float32)
    lc = num_labels * num_classes
    lc_pad = ((lc + 127) // 128) * 128
    head_w = jnp.zeros((lc_pad, image_dim), jnp.float32)
    head_w = head_w.at[:lc].set(w_labels.reshape(lc, image_dim))
    head_b = jnp.zeros((lc_pad, 1), jnp.float32)
    head_b = head_b.at[:lc, 0].set(b_labels.reshape(lc))
    return dict(
        feat_w=feat_w.astype(jnp.bfloat16),   # bf16 MXU operand, f32 accumulate
        feat_b=feat_b,                        # bias / relu / pool stay f32
        head_w=head_w.astype(jnp.bfloat16),
        head_b=head_b,
    )


# Pure-JAX reference (same math, f32 everywhere) for a tolerance check.
def reference_forward(x_nchw, params, *, multi_image, num_labels, num_classes):
    if multi_image > 1:
        x_nchw = x_nchw.reshape((-1,) + x_nchw.shape[2:])
    fw = params["feat_w"].astype(jnp.float32)
    fb = params["feat_b"][:, 0]
    y = jnp.einsum("nchw,dc->ndhw", x_nchw, fw) + fb[None, :, None, None]
    y = jnp.maximum(y, 0.0)
    feats = y.mean(axis=(2, 3))
    if multi_image > 1:
        feats = feats.reshape(-1, multi_image, feats.shape[-1]).max(axis=1)
    lc = num_labels * num_classes
    hw = params["head_w"].astype(jnp.float32)[:lc]
    hb = params["head_b"][:lc, 0]
    out = feats @ hw.T + hb[None, :]
    return jnp.transpose(out.reshape(-1, num_labels, num_classes), (0, 2, 1))


if __name__ == "__main__":
    key = jax.random.PRNGKey(0)
    kx, kp = jax.random.split(key)

    B, C, H, W = 2, 4, 16, 16
    image_dim, num_labels, num_classes = 32, 14, 3

    params = init_params(kp, C, image_dim, num_labels, num_classes)
    x = jax.random.normal(kx, (B, C, H, W), jnp.float32)

    # multi_image = 1 path (heads fused into the pooling epilogue)
    out1 = image_classification_forward(
        x, params, multi_image=1, num_labels=num_labels, num_classes=num_classes)
    out1 = jax.block_until_ready(out1)
    assert out1.shape == (B, num_classes, num_labels), out1.shape
    assert out1.dtype == jnp.float32
    ref1 = reference_forward(x, params, multi_image=1,
                             num_labels=num_labels, num_classes=num_classes)
    assert bool(jnp.allclose(out1, ref1, rtol=2e-2, atol=2e-2))

    # multi_image = 2 path (pool kernel + max-deflatten + separate heads kernel)
    x2 = x.reshape(1, 2, C, H, W)
    out2 = image_classification_forward(
        x2, params, multi_image=2, num_labels=num_labels, num_classes=num_classes)
    out2 = jax.block_until_ready(out2)
    assert out2.shape == (1, num_classes, num_labels), out2.shape
    ref2 = reference_forward(x2, params, multi_image=2,
                             num_labels=num_labels, num_classes=num_classes)
    assert bool(jnp.allclose(out2, ref2, rtol=2e-2, atol=2e-2))

    print("KERNEL_OK")
</pallas_src>

<mosaic_0001>
module attributes {stable_mosaic.version = 11 : i64} {
  func.func @kernel(%arg0: i32, %arg1: i32, %arg2: memref<1x4x256xf32, #tpu.memory_space<vmem>>, %arg3: memref<32x4xbf16, #tpu.memory_space<vmem>>, %arg4: memref<32x1xf32, #tpu.memory_space<vmem>>, %arg5: memref<128x32xbf16, #tpu.memory_space<vmem>>, %arg6: memref<128x1xf32, #tpu.memory_space<vmem>>, %arg7: memref<1x128x1xf32, #tpu.memory_space<vmem>>, %arg8: memref<32x1xf32, #tpu.memory_space<vmem>>) attributes {dimension_semantics = [#tpu.dimension_semantics<parallel>, #tpu.dimension_semantics<arbitrary>], iteration_bounds = array<i64: 2, 1>, scalar_prefetch = 0 : i64, scratch_operands = 1 : i64, tpu.core_type = #tpu.core_type<tc>, window_params = [{transform_indices = @transform_0, window_bounds = array<i64: 1, 4, 256>}, {pipeline_mode = #tpu.pipeline_mode<synchronous>, transform_indices = @transform_1, window_bounds = array<i64: 32, 4>}, {pipeline_mode = #tpu.pipeline_mode<synchronous>, transform_indices = @transform_2, window_bounds = array<i64: 32, 1>}, {pipeline_mode = #tpu.pipeline_mode<synchronous>, transform_indices = @transform_3, window_bounds = array<i64: 128, 32>}, {pipeline_mode = #tpu.pipeline_mode<synchronous>, transform_indices = @transform_4, window_bounds = array<i64: 128, 1>}, {transform_indices = @transform_5, window_bounds = array<i64: 1, 128, 1>}]} {
    %c0_i32 = arith.constant 0 : i32
    %0 = arith.cmpi eq, %arg1, %c0_i32 : i32
    %1 = arith.extui %0 : i1 to i32
    %c0_i32_0 = arith.constant 0 : i32
    %2 = arith.cmpi ne, %1, %c0_i32_0 : i32
    scf.if %2 {
      %cst_15 = arith.constant 0.000000e+00 : f32
      %21 = vector.broadcast %cst_15 : f32 to vector<32x1xf32>
      %c0_16 = arith.constant 0 : index
      %c0_17 = arith.constant 0 : index
      %22 = vector.load %arg8[%c0_16, %c0_17] : memref<32x1xf32, #tpu.memory_space<vmem>>, vector<32x1xf32>
      tpu.vector_store %arg8[%c0_16, %c0_17], %21 {strides = array<i32>} : memref<32x1xf32, #tpu.memory_space<vmem>>, vector<32x1xf32>,
    } else {
    }
    %c0 = arith.constant 0 : index
    %c0_1 = arith.constant 0 : index
    %c0_2 = arith.constant 0 : index
    %3 = vector.load %arg2[%c0, %c0_1, %c0_2] : memref<1x4x256xf32, #tpu.memory_space<vmem>>, vector<1x4x256xf32>
    %4 = vector.shape_cast %3 : vector<1x4x256xf32> to vector<4x256xf32>
    %5 = arith.truncf %4 : vector<4x256xf32> to vector<4x256xbf16>
    %c0_3 = arith.constant 0 : index
    %c0_4 = arith.constant 0 : index
    %6 = vector.load %arg3[%c0_3, %c0_4] : memref<32x4xbf16, #tpu.memory_space<vmem>>, vector<32x4xbf16>
    %cst = arith.constant dense<0.000000e+00> : vector<32x256xf32>
    %7 = tpu.matmul %6, %5, %cst {dimension_numbers = #tpu.dot_dimension_numbers<[1], [0], [0], [1], [0, 0, 1, 1], [], []>} : vector<32x4xbf16>, vector<4x256xbf16>, vector<32x256xf32> -> vector<32x256xf32>
    %c0_5 = arith.constant 0 : index
    %c0_6 = arith.constant 0 : index
    %8 = vector.load %arg4[%c0_5, %c0_6] : memref<32x1xf32, #tpu.memory_space<vmem>>, vector<32x1xf32>
    %9 = vector.broadcast %8 : vector<32x1xf32> to vector<32x256xf32>
    %10 = arith.addf %7, %9 : vector<32x256xf32>
    %cst_7 = arith.constant 0.000000e+00 : f32
    %11 = vector.broadcast %cst_7 : f32 to vector<32x256xf32>
    %12 = arith.maximumf %10, %11 : vector<32x256xf32>
    %c0_8 = arith.constant 0 : index
    %c0_9 = arith.constant 0 : index
    %13 = vector.load %arg8[%c0_8, %c0_9] : memref<32x1xf32, #tpu.memory_space<vmem>>, vector<32x1xf32>
    %cst_10 = arith.constant dense<0.000000e+00> : vector<32xf32>
    %14 = vector.multi_reduction <add>, %12, %cst_10 [1] : vector<32x256xf32> to vector<32xf32>
    %15 = vector.shape_cast %14 : vector<32xf32> to vector<32x1xf32>
    %16 = arith.addf %13, %15 : vector<32x1xf32>
    %c0_11 = arith.constant 0 : index
    %c0_12 = arith.constant 0 : index
    %17 = vector.load %arg8[%c0_11, %c0_12] : memref<32x1xf32, #tpu.memory_space<vmem>>, vector<32x1xf32>
    tpu.vector_store %arg8[%c0_11, %c0_12], %16 {strides = array<i32>} : memref<32x1xf32, #tpu.memory_space<vmem>>, vector<32x1xf32>,
    %c0_i32_13 = arith.constant 0 : i32
    %18 = arith.cmpi eq, %arg1, %c0_i32_13 : i32
    %19 = arith.extui %18 : i1 to i32
    %c0_i32_14 = arith.constant 0 : i32
    %20 = arith.cmpi ne, %19, %c0_i32_14 : i32
    scf.if %20 {
      %c0_15 = arith.constant 0 : index
      %c0_16 = arith.constant 0 : index
      %21 = vector.load %arg8[%c0_15, %c0_16] : memref<32x1xf32, #tpu.memory_space<vmem>>, vector<32x1xf32>
      %cst_17 = arith.constant 3.906250e-03 : f32
      %22 = vector.broadcast %cst_17 : f32 to vector<32x1xf32>
      %23 = arith.mulf %21, %22 : vector<32x1xf32>
      %24 = arith.truncf %23 : vector<32x1xf32> to vector<32x1xbf16>
      %c0_18 = arith.constant 0 : index
      %c0_19 = arith.constant 0 : index
      %25 = vector.load %arg5[%c0_18, %c0_19] : memref<128x32xbf16, #tpu.memory_space<vmem>>, vector<128x32xbf16>
      %cst_20 = arith.constant dense<0.000000e+00> : vector<128x1xf32>
      %26 = tpu.matmul %25, %24, %cst_20 {dimension_numbers = #tpu.dot_dimension_numbers<[1], [0], [0], [1], [0, 0, 1, 1], [], []>} : vector<128x32xbf16>, vector<32x1xbf16>, vector<128x1xf32> -> vector<128x1xf32>
      %c0_21 = arith.constant 0 : index
      %c0_22 = arith.constant 0 : index
      %27 = vector.load %arg6[%c0_21, %c0_22] : memref<128x1xf32, #tpu.memory_space<vmem>>, vector<128x1xf32>
      %28 = arith.addf %26, %27 : vector<128x1xf32>
      %c0_23 = arith.constant 0 : index
      %c0_24 = arith.constant 0 : index
      %c0_25 = arith.constant 0 : index
      %29 = vector.load %arg7[%c0_23, %c0_24, %c0_25] : memref<1x128x1xf32, #tpu.memory_space<vmem>>, vector<1x128x1xf32>
      %30 = vector.shape_cast %29 : vector<1x128x1xf32> to vector<128x1xf32>
      %31 = vector.shape_cast %28 : vector<128x1xf32> to vector<1x128x1xf32>
      tpu.vector_store %arg7[%c0_23, %c0_24, %c0_25], %31 {strides = array<i32>} : memref<1x128x1xf32, #tpu.memory_space<vmem>>, vector<1x128x1xf32>,
    } else {
    }
    return
  }
  func.func @transform_0(%arg0: i32, %arg1: i32) -> (i32, i32, i32) {
    %c0_i32 = arith.constant 0 : i32
    %c0_i32_0 = arith.constant 0 : i32
    return %arg0, %c0_i32, %arg1 : i32, i32, i32
  }
  func.func @transform_1(%arg0: i32, %arg1: i32) -> (i32, i32) {
    %c0_i32 = arith.constant 0 : i32
    %c0_i32_0 = arith.constant 0 : i32
    %c0_i32_1 = arith.constant 0 : i32
    return %c0_i32, %c0_i32_0 : i32, i32
  }
  func.func @transform_2(%arg0: i32, %arg1: i32) -> (i32, i32) {
    %c0_i32 = arith.constant 0 : i32
    %c0_i32_0 = arith.constant 0 : i32
    %c0_i32_1 = arith.constant 0 : i32
    return %c0_i32, %c0_i32_0 : i32, i32
  }
  func.func @transform_3(%arg0: i32, %arg1: i32) -> (i32, i32) {
    %c0_i32 = arith.constant 0 : i32
    %c0_i32_0 = arith.constant 0 : i32
    %c0_i32_1 = arith.constant 0 : i32
    return %c0_i32, %c0_i32_0 : i32, i32
  }
  func.func @transform_4(%arg0: i32, %arg1: i32) -> (i32, i32) {
    %c0_i32 = arith.constant 0 : i32
    %c0_i32_0 = arith.constant 0 : i32
    %c0_i32_1 = arith.constant 0 : i32
    return %c0_i32, %c0_i32_0 : i32, i32
  }
  func.func @transform_5(%arg0: i32, %arg1: i32) -> (i32, i32, i32) {
    %c0_i32 = arith.constant 0 : i32
    %c0_i32_0 = arith.constant 0 : i32
    %c0_i32_1 = arith.constant 0 : i32
    return %arg0, %c0_i32, %c0_i32_0 : i32, i32, i32
  }
}

</mosaic_0001>

<bundles_post_ra>
// kernel: squeeze.1
= control target key start
LH: loop header
LB: loop body
LE: loop exit
PB: predicated region body
PF: predicated region fallthrough
CT: control target
= control target key end

     0   :  { %s115_s8 = smov 119   ;;  %vm8_vm0 = vcmask 23552   ;;  %s116_s9 = smov 122   ;;  %s196_s0 = inlined_call_operand.vmem [shape: f32[2,42], index: 0, kind: input, shape index: {}]   ;;  %s197_s1 = inlined_call_operand.vmem [shape: f32[2,14,3], index: 1, kind: output, shape index: {}]  }
   0x1   :  { %v5_v0 = vld [vmem:[%s196_s0] sm:$0x3]  ;;  %s114_s0 = smov 125   ;;  %s117_s10 = smov 116  }
   0x2   :  { %6 = vst [vmem:[#allocation0] sm:$0x3] %v5_v0  ;;  %s118_s13 = smov 113   ;;  %s119_s14 = smov 110  }
   0x3   :  { %s120_s15 = smov 107   ;;  %s121_s16 = smov 104  }
   0x4   :  { %s122_s17 = smov 101   ;;  %s123_s18 = smov 98  }
   0x5   :  { %s124_s19 = smov 95   ;;  %s125_s20 = smov 92  }
   0x6   :  { %s126_s21 = smov 89  }
   0x9   :  { %v10_v1 = vld [vmem:[#allocation0] sm:$0x3]  }
   0xa   :  { %v22_v2 = vld [vmem:[#allocation0] sm:$0x3]   ;;  %11 = vrot.lane.b32.xlu0 %v10_v1, %s114_s0 }
   0xb   :  { %23 = vrot.lane.b32.xlu1 %v22_v2, %s115_s8  ;;  %v16_v3 = vld [vmem:[#allocation0] sm:$0x3]  }
   0xc   :  { %v28_v4 = vld [vmem:[#allocation0] sm:$0x3]  }
   0xd   :  { %v7_v5 = vld [vmem:[#allocation0] sm:$0x3]  }
   0xe   :  { %17 = vrot.lane.b32.xlu0 %v16_v3, %s116_s9  ;;  %9 = vst.msk [vmem:[%s197_s1] ss:$16 sm:$0x3] %vm8_vm0, %v7_v5   ;;  %v34_v6 = vld [vmem:[#allocation0] sm:$0x3]  }
   0xf   :  { %29 = vrot.lane.b32.xlu1 %v28_v4, %s117_s10  ;;  %v40_v7 = vld [vmem:[#allocation0] sm:$0x3]  }
  0x10   :  { %v46_v8 = vld [vmem:[#allocation0] sm:$0x3]  }
  0x11   :  { %v52_v9 = vld [vmem:[#allocation0] sm:$0x3]  }
  0x12   :  { %35 = vrot.lane.b32.xlu0 %v34_v6, %s118_s13  ;;  %v58_v10 = vld [vmem:[#allocation0] sm:$0x3]  }
  0x13   :  { %41 = vrot.lane.b32.xlu1 %v40_v7, %s119_s14  ;;  %v64_v11 = vld [vmem:[#allocation0] sm:$0x3]  }
  0x14   :  { %v70_v12 = vld [vmem:[#allocation0] sm:$0x3]  }
  0x15   :  { %v76_v13 = vld [vmem:[#allocation0] sm:$0x3]  }
  0x16   :  { %47 = vrot.lane.b32.xlu0 %v46_v8, %s120_s15  ;;  %v82_v14 = vld [vmem:[#allocation0] sm:$0x3]  }
  0x17   :  { %53 = vrot.lane.b32.xlu1 %v52_v9, %s121_s16 }
  0x1a   :  { %59 = vrot.lane.b32.xlu0 %v58_v10, %s122_s17 }
  0x1b   :  { %65 = vrot.lane.b32.xlu1 %v64_v11, %s123_s18 }
  0x1e   :  { %71 = vrot.lane.b32.xlu0 %v70_v12, %s124_s19 }
  0x1f   :  { %77 = vrot.lane.b32.xlu1 %v76_v13, %s125_s20 }
  0x22   :  { %83 = vrot.lane.b32.xlu0 %v82_v14, %s126_s21 }
  0x7c   :  { %v12_v15 = vpop.permute.xlu0 %11  }
  0x7d   :  { %v24_v16 = vpop.permute.xlu1 %23   ;;  %88 = vst.msk [vmem:[%s197_s1 + $0x1] ss:$16 sm:$0x3] %vm8_vm0, %v12_v15  }
  0x7e   :  { %90 = vst.msk [vmem:[%s197_s1 + $0x3] ss:$16 sm:$0x3] %vm8_vm0, %v24_v16  }
  0x80   :  { %v18_v17 = vpop.permute.xlu0 %17  }
  0x81   :  { %v30_v18 = vpop.permute.xlu1 %29   ;;  %89 = vst.msk [vmem:[%s197_s1 + $0x2] ss:$16 sm:$0x3] %vm8_vm0, %v18_v17  }
  0x82   :  { %91 = vst.msk [vmem:[%s197_s1 + $0x4] ss:$16 sm:$0x3] %vm8_vm0, %v30_v18  }
  0x84   :  { %v36_v19 = vpop.permute.xlu0 %35  }
  0x85   :  { %v42_v20 = vpop.permute.xlu1 %41   ;;  %92 = vst.msk [vmem:[%s197_s1 + $0x5] ss:$16 sm:$0x3] %vm8_vm0, %v36_v19  }
  0x86   :  { %93 = vst.msk [vmem:[%s197_s1 + $0x6] ss:$16 sm:$0x3] %vm8_vm0, %v42_v20  }
  0x88   :  { %v48_v21 = vpop.permute.xlu0 %47  }
  0x89   :  { %v54_v22 = vpop.permute.xlu1 %53   ;;  %94 = vst.msk [vmem:[%s197_s1 + $0x7] ss:$16 sm:$0x3] %vm8_vm0, %v48_v21  }
  0x8a   :  { %95 = vst.msk [vmem:[%s197_s1 + $0x8] ss:$16 sm:$0x3] %vm8_vm0, %v54_v22  }
  0x8c   :  { %v60_v23 = vpop.permute.xlu0 %59  }
  0x8d   :  { %v66_v24 = vpop.permute.xlu1 %65   ;;  %96 = vst.msk [vmem:[%s197_s1 + $0x9] ss:$16 sm:$0x3] %vm8_vm0, %v60_v23  }
  0x8e   :  { %97 = vst.msk [vmem:[%s197_s1 + $0xa] ss:$16 sm:$0x3] %vm8_vm0, %v66_v24  }
  0x90   :  { %v72_v25 = vpop.permute.xlu0 %71  }
  0x91   :  { %v78_v26 = vpop.permute.xlu1 %77   ;;  %98 = vst.msk [vmem:[%s197_s1 + $0xb] ss:$16 sm:$0x3] %vm8_vm0, %v72_v25  }
  0x92   :  { %99 = vst.msk [vmem:[%s197_s1 + $0xc] ss:$16 sm:$0x3] %vm8_vm0, %v78_v26  }
  0x94   :  { %v84_v27 = vpop.permute.xlu0 %83  }
  0x95   :  { %100 = vst.msk [vmem:[%s197_s1 + $0xd] ss:$16 sm:$0x3] %vm8_vm0, %v84_v27  }

// kernel: image_classification_forward.1
= control target key start
LH: loop header
LB: loop body
LE: loop exit
PB: predicated region body
PF: predicated region fallthrough
CT: control target
= control target key end

     0   :  { %s862_s18 = smov 0   ;;  %s864_s19 = smov 0   ;;  %s1039_s0 = inlined_call_operand.vmem [shape: f32[2,4,256], index: 0, kind: input, shape index: {}]   ;;  %s1040_s1 = inlined_call_operand.vmem [shape: bf16[32,4], index: 1, kind: input, shape index: {}]   ;;  %s1041_s2 = inlined_call_operand.vmem [shape: f32[32,1], index: 2, kind: input, shape index: {}]   ;;  %s1042_s3 = inlined_call_operand.vmem [shape: bf16[128,32], index: 3, kind: input, shape index: {}]   ;;  %s1043_s4 = inlined_call_operand.vmem [shape: f32[128,1], index: 4, kind: input, shape index: {}]   ;;  %s1044_s5 = inlined_call_operand.vmem [shape: f32[2,128,1], index: 5, kind: output, shape index: {}]  }
   0x1   :  { %s866_s20 = smov 0  }
   0x2 LB: > { %s27_s21 = sadd.s32 1, %s824_s19  ;;  %p703_p0 = scmp.ge.s32.totalorder %s828_s20, 1  ;;  %s828_s20 = sphi %s866_s20, %s15_s20   ;;  %s824_s19 = sphi %s864_s19, %s1046_s19   ;;  %s820_s18 = sphi %s862_s18, %s1045_s18  }
   0x3   : > { %p29_p1 = scmp.ge.s32.totalorder %s27_s21, 2  ;;  %p206_p2 = scmp.lt.s32.totalorder %s828_s20, 3 }
   0x5   : > { %s1048_s21 = smov (%p29_p1, %s27_s21), 0  ;;  %p207_p3 = pnand %p703_p0, %p206_p2 }
   0x6   : > { %p239_p4 = scmp.lt.s32.totalorder (!%p207_p3), %s820_s18, 1 }
   0x7   : > { %210 = sbr.rel (%p207_p3) target bundleno = 615 (0x267), region = 40 }
   0xc   : > { %v830_v0 = vmov 0   ;;  %s1050_s18 = smov (!%p239_p4, %s820_s18), 1  ;;  %v273_v1 = vld [vmem:[%s1041_s2] sm:$0xff]  ;;  %v274_v2 = vld [vmem:[%s1041_s2 + $0x8] sm:$0xff]  ;;  %v275_v3 = vld [vmem:[%s1041_s2 + $0x10] sm:$0xff]  ;;  %vm314_vm0 = vcmask 1041408  }
   0xd   : > { %353 = vmatprep.mubr.bf16.mxu0 %v830_v0  ;;  %794 = vset.pattern.permute.xlu1 %v830_v0  ;;  %s731_s28 = sshll.u32 %s1050_s18, 3  ;;  %v276_v4 = vld [vmem:[%s1041_s2 + $0x18] sm:$0xff]  ;;  %v796_v10 = vld [vmem:[%s1040_s1] sm:$0xff]   ;;  %vm307_vm1 = vcmask 31744   ;;  %v797_v11 = vld [vmem:[%s1040_s1 + $0x8] sm:$0xff]   ;;  %vm258_vm2 = vcmask 7168  }
   0xe   : > { %793 = vset.pattern.permute.xlu0 %v830_v0  ;;  %279 = vperm.xlu1 %794, %v273_v1   ;;  %s246_s8 = scalar_lea.vmem %s1039_s0, %s731_s28  ;;  %v831_v12 = vmov 0.0   ;;  %v798_v45 = vld [vmem:[%s1042_s3 + $0x10] sm:$0xff]   ;;  %vm492_vm3 = vcmask 261120   ;;  %v802_v46 = vld [vmem:[%s1042_s3] sm:$0xff]  }
   0xf   : > { %289 = vperm.xlu0 %793, %v275_v3   ;;  %v263_v5 = vld [vmem:[%s246_s8] sm:$0xff]  ;;  %261 = vst.msk [vmem:[#allocation2 + $0x10] sm:$0xff] %vm258_vm2, %v831_v12  ;;  %259 = vst.msk [vmem:[#allocation2] sm:$0xff] %vm258_vm2, %v831_v12  ;;  %751 = vmatprep.mubr.msk.bf16.mxu1 %vm492_vm3, %v798_v45  ;;  %s732_s8 = sshll.u32 %s1050_s18, 7 }
  0x10   : > { %v265_v6 = vcombine.high %v263_v5, %v263_v5  ;;  %v267_v7 = vpack.c.bf16 %v263_v5, %v263_v5  ;;  %260 = vst.msk [vmem:[#allocation2 + $0x8] sm:$0xff] %vm258_vm2, %v831_v12  ;;  %262 = vst.msk [vmem:[#allocation2 + $0x18] sm:$0xff] %vm258_vm2, %v831_v12  ;;  %v799_v5 = vld [vmem:[%s1042_s3 + $0x18] sm:$0xff]   ;;  %v438_v12 = vld [vmem:[%s1043_s4 + $0x10] sm:$0xff]  ;;  %s954_s15 = scalar_lea.vmem %s1044_s5, %s732_s8 }
  0x12   : > { %284 = vperm.xlu1 %794, %v274_v2   ;;  %v268_v8 = vpack.c.bf16 %v265_v6, %v265_v6  ;;  %v316_v9 = vsel %vm314_vm0, %v267_v7, 0  ;;  %v803_v6 = vld [vmem:[%s1042_s3 + $0x8] sm:$0xff]   ;;  %v800_v7 = vld [vmem:[%s1042_s3 + $0x20] sm:$0xff]  }
  0x13   : > { %294 = vperm.xlu0 %793, %v276_v4  }
  0x14   : > { %710 = vmatprep.subr.msk.bf16.mxu0 %vm314_vm0, %v268_v8  ;;  %v801_v8 = vld [vmem:[%s1042_s3 + $0x28] sm:$0xff]  }
  0x15   : > { %336 = vmatpush1.bf16.msra.mxu0 %v316_v9  ;;  %v804_v9 = vld [vmem:[%s1042_s3 + $0x30] sm:$0xff]  }
  0x16   : > { %v384_v47 = vld [vmem:[#allocation2 + $0x10] sm:$0xff]  ;;  %v382_v51 = vld [vmem:[#allocation2] sm:$0xff] }
  0x17   : > { %v385_v50 = vld [vmem:[#allocation2 + $0x18] sm:$0xff]  ;;  %v383_v56 = vld [vmem:[#allocation2 + $0x8] sm:$0xff] }
  0x18   : > { %711 = vmatmul.mubr.msk.bf16.vlgmr.msra.gmra.mxu0 %vm307_vm1, %v796_v10  ;;  %v805_v10 = vld [vmem:[%s1042_s3 + $0x38] sm:$0xff]  }
  0x19   : > { %363 = vmatprep.mubr.bf16.mxu0 %v830_v0 }
  0x20   : > { %712 = vmatmul.mubr.msk.bf16.gmra.mxu0 %vm307_vm1, %v797_v11  ;;  %v442_v11 = vld [vmem:[%s1043_s4 + $0x30] sm:$0xff] }
  0x21   : > { %747 = vmatprep.mubr.msk.bf16.mxu0 %vm492_vm3, %v802_v46  ;;  %v450_v46 = vld [vmem:[%s1043_s4 + $0x70] sm:$0xff] }
  0x89   : > { %v280_v18 = vpop.permute.xlu1 %279 }
  0x8a   : > { %v290_v16 = vpop.permute.xlu0 %289 }
  0x8d   : > { %v285_v30 = vpop.permute.xlu1 %284 }
  0x8e   : > { %v295_v24 = vpop.permute.xlu0 %294 }
  0xd8   : > { %v355_v13 = vpop.f32.mrf.mxu0 }
  0xd9   : > { %v356_v26 = vadd.f32 %v355_v13, %v280_v18 }
  0xda   : > { %v357_v14 = vpop.f32.mrf.mxu0 }
  0xdb   : > { %v358_v22 = vadd.f32 %v357_v14, %v280_v18  ;;  %v374_v36 = vmax.f32 %v356_v26, 0.0  ;;  %v440_v14 = vld [vmem:[%s1043_s4 + $0x20] sm:$0xff]  ;;  %v441_v26 = vld [vmem:[%s1043_s4 + $0x28] sm:$0xff] }
  0xdc   : > { %v359_v15 = vpop.f32.mrf.mxu0 }
  0xdd   : > { %v375_v32 = vmax.f32 %v358_v22, 0.0  ;;  %v360_v37 = vadd.f32 %v359_v15, %v285_v30  ;;  %v439_v22 = vld [vmem:[%s1043_s4 + $0x18] sm:$0xff] }
  0xde   : > { %v361_v17 = vpop.f32.mrf.mxu0 }
  0xdf   : > { %v362_v33 = vadd.f32 %v361_v17, %v285_v30  ;;  %v386_v42 = vadd.f32 %v375_v32, %v374_v36  ;;  %v376_v43 = vmax.f32 %v360_v37, 0.0  ;;  %v446_v32 = vld [vmem:[%s1043_s4 + $0x50] sm:$0xff]  ;;  %v444_v37 = vld [vmem:[%s1043_s4 + $0x40] sm:$0xff] }
  0xe0   : > { %v365_v19 = vpop.f32.mrf.mxu0 }
  0xe1   : > { %v366_v20 = vadd.f32 %v365_v19, %v290_v16  ;;  %v377_v40 = vmax.f32 %v362_v33, 0.0 }
  0xe2   : > { %v367_v21 = vpop.f32.mrf.mxu0 }
  0xe3   : > { %v368_v23 = vadd.f32 %v367_v21, %v290_v16  ;;  %v378_v27 = vmax.f32 %v366_v20, 0.0  ;;  %v389_v44 = vadd.f32 %v377_v40, %v376_v43  ;;  %v436_v16 = vld [vmem:[%s1043_s4] sm:$0xff]  ;;  %v443_v20 = vld [vmem:[%s1043_s4 + $0x38] sm:$0xff]  ;;  %v445_v43 = vld [vmem:[%s1043_s4 + $0x48] sm:$0xff] }
  0xe4   : > { %v369_v25 = vpop.f32.mrf.mxu0  ;;  %v447_v40 = vld [vmem:[%s1043_s4 + $0x58] sm:$0xff] }
  0xe5   : > { %v379_v28 = vmax.f32 %v368_v23, 0.0  ;;  %v370_v29 = vadd.f32 %v369_v25, %v295_v24 }
  0xe6   : > { %v371_v31 = vpop.f32.mrf.mxu0 }
  0xe7   : > { %v372_v34 = vadd.f32 %v371_v31, %v295_v24  ;;  %v392_v35 = vadd.f32 %v379_v28, %v378_v27  ;;  %v380_v38 = vmax.f32 %v370_v29, 0.0  ;;  %v437_v28 = vld [vmem:[%s1043_s4 + $0x8] sm:$0xff] }
  0xe9   : > { %v381_v39 = vmax.f32 %v372_v34, 0.0  ;;  %393 = vadd.xlane.f32.xlu0 %v392_v35 }
  0xeb   : > { %v395_v41 = vadd.f32 %v381_v39, %v380_v38 }
  0xed   : > { %396 = vadd.xlane.f32.xlu1 %v395_v41  ;;  %387 = vadd.xlane.f32.xlu0 %v386_v42 }
  0xf1   : > { %390 = vadd.xlane.f32.xlu0 %v389_v44 }
 0x172   : > { %v394_v48 = vpop.xlane.xlu0 %393 }
 0x173   : > { %v400_v49 = vadd.f32 %v394_v48, %v384_v47 }
 0x175   : > { %405 = vst.msk [vmem:[#allocation2 + $0x10] sm:$0xff] %vm258_vm2, %v400_v49  ;;  %v448_v49 = vld [vmem:[%s1043_s4 + $0x60] sm:$0xff] }
 0x176   : > { %v397_v52 = vpop.xlane.xlu1 %396  ;;  %v388_v53 = vpop.xlane.xlu0 %387 }
 0x177   : > { %v401_v54 = vadd.f32 %v397_v52, %v385_v50  ;;  %v398_v55 = vadd.f32 %v388_v53, %v382_v51  ;;  %v451_v52 = vld [vmem:[%s1043_s4 + $0x78] sm:$0xff] }
 0x179   : > { %406 = vst.msk [vmem:[#allocation2 + $0x18] sm:$0xff] %vm258_vm2, %v401_v54  ;;  %403 = vst.msk [vmem:[#allocation2] sm:$0xff] %vm258_vm2, %v398_v55  ;;  %v449_v55 = vld [vmem:[%s1043_s4 + $0x68] sm:$0xff] }
 0x17a   : > { %v391_v57 = vpop.xlane.xlu0 %390 }
 0x17b   : > { %v399_v58 = vadd.f32 %v391_v57, %v383_v56 }
 0x17c   : > { %v412_v59 = vld [vmem:[#allocation2 + $0x10] sm:$0xff] }
 0x17d   : > { %404 = vst.msk [vmem:[#allocation2 + $0x8] sm:$0xff] %vm258_vm2, %v399_v58  ;;  %v416_v61 = vmul.f32 0.00390625, %v412_v59 }
 0x180   : > { %v413_v60 = vld [vmem:[#allocation2 + $0x18] sm:$0xff]  ;;  %v410_v63 = vld [vmem:[#allocation2] sm:$0xff] }
 0x181   : > { %v417_v62 = vmul.f32 0.00390625, %v413_v60  ;;  %v414_v2 = vmul.f32 0.00390625, %v410_v63 }
 0x183   : > { %v419_v0 = vpack.c.bf16 %v417_v62, %v416_v61 }
 0x184   : > { %v411_v1 = vld [vmem:[#allocation2 + $0x8] sm:$0xff] }
 0x185   : > { %743 = vmatprep.subr.bf16.mxu0 %v419_v0  ;;  %763 = vmatprep.subr.bf16.mxu1 %v419_v0  ;;  %v415_v3 = vmul.f32 0.00390625, %v411_v1 }
 0x186   : > { %744 = vmatpush3.bf16.msra.mxu0 %v419_v0  ;;  %765 = vmatpush3.bf16.msra.mxu1 %v419_v0 }
 0x187   : > { %v418_v4 = vpack.c.bf16 %v415_v3, %v414_v2 }
 0x189   : > { %745 = vmatprep.subr.bf16.mxu0 %v418_v4  ;;  %764 = vmatprep.subr.bf16.mxu1 %v418_v4 }
 0x18a   : > { %746 = vmatpush3.bf16.msra.mxu0 %v418_v4  ;;  %766 = vmatpush3.bf16.msra.mxu1 %v418_v4 }
 0x18d   : > { %752 = vmatmul.mubr.msk.bf16.vlgmr.msra.gmra.mxu1 %vm492_vm3, %v799_v5  ;;  %748 = vmatmul.mubr.msk.bf16.vlgmr.msra.gmra.mxu0 %vm492_vm3, %v803_v6 }
 0x18e   : > { %755 = vmatprep.mubr.msk.bf16.mxu1 %vm492_vm3, %v800_v7 }
 0x195   : > { %756 = vmatmul.mubr.msk.bf16.gmra.mxu1 %vm492_vm3, %v801_v8 }
 0x196   : > { %759 = vmatprep.mubr.msk.bf16.mxu1 %vm492_vm3, %v804_v9 }
 0x19d   : > { %760 = vmatmul.mubr.msk.bf16.gmra.mxu1 %vm492_vm3, %v805_v10 }
 0x24d   : > { %v753_v13 = vpop.f32.mrf.mxu1  ;;  %v749_v15 = vpop.f32.mrf.mxu0 }
 0x24e   : > { %v576_v17 = vadd.f32 %v753_v13, %v442_v11  ;;  %v560_v18 = vadd.f32 %v749_v15, %v438_v12 }
 0x24f   : > { %v567_v19 = vpop.f32.mrf.mxu1  ;;  %v551_v21 = vpop.f32.mrf.mxu0 }
 0x250   : > { %620 = vst.msk [vmem:[%s954_s15 + $0x30] sm:$0xff] %vm258_vm2, %v576_v17  ;;  %v568_v23 = vadd.f32 %v567_v19, %v440_v14  ;;  %616 = vst.msk [vmem:[%s954_s15 + $0x10] sm:$0xff] %vm258_vm2, %v560_v18  ;;  %v552_v24 = vadd.f32 %v551_v21, %v436_v16 }
 0x251   : > { %v754_v25 = vpop.f32.mrf.mxu1  ;;  %v750_v27 = vpop.f32.mrf.mxu0 }
 0x252   : > { %618 = vst.msk [vmem:[%s954_s15 + $0x20] sm:$0xff] %vm258_vm2, %v568_v23  ;;  %v579_v29 = vadd.f32 %v754_v25, %v443_v20  ;;  %614 = vst.msk [vmem:[%s954_s15] sm:$0xff] %vm258_vm2, %v552_v24  ;;  %v563_v30 = vadd.f32 %v750_v27, %v439_v22 }
 0x253   : > { %v570_v31 = vpop.f32.mrf.mxu1  ;;  %v554_v33 = vpop.f32.mrf.mxu0 }
 0x254   : > { %621 = vst.msk [vmem:[%s954_s15 + $0x38] sm:$0xff] %vm258_vm2, %v579_v29  ;;  %v571_v34 = vadd.f32 %v570_v31, %v441_v26  ;;  %617 = vst.msk [vmem:[%s954_s15 + $0x18] sm:$0xff] %vm258_vm2, %v563_v30  ;;  %v555_v35 = vadd.f32 %v554_v33, %v437_v28 }
 0x255   : > { %v757_v36 = vpop.f32.mrf.mxu1 }
 0x256   : > { %619 = vst.msk [vmem:[%s954_s15 + $0x28] sm:$0xff] %vm258_vm2, %v571_v34  ;;  %v592_v38 = vadd.f32 %v757_v36, %v446_v32  ;;  %615 = vst.msk [vmem:[%s954_s15 + $0x8] sm:$0xff] %vm258_vm2, %v555_v35 }
 0x257   : > { %v583_v39 = vpop.f32.mrf.mxu1 }
 0x258   : > { %624 = vst.msk [vmem:[%s954_s15 + $0x50] sm:$0xff] %vm258_vm2, %v592_v38  ;;  %v584_v41 = vadd.f32 %v583_v39, %v444_v37 }
 0x259   : > { %v758_v42 = vpop.f32.mrf.mxu1 }
 0x25a   : > { %622 = vst.msk [vmem:[%s954_s15 + $0x40] sm:$0xff] %vm258_vm2, %v584_v41  ;;  %v595_v44 = vadd.f32 %v758_v42, %v447_v40 }
 0x25b   : > { %v586_v45 = vpop.f32.mrf.mxu1 }
 0x25c   : > { %625 = vst.msk [vmem:[%s954_s15 + $0x58] sm:$0xff] %vm258_vm2, %v595_v44  ;;  %v587_v47 = vadd.f32 %v586_v45, %v445_v43 }
 0x25d   : > { %v761_v48 = vpop.f32.mrf.mxu1 }
 0x25e   : > { %623 = vst.msk [vmem:[%s954_s15 + $0x48] sm:$0xff] %vm258_vm2, %v587_v47  ;;  %v608_v50 = vadd.f32 %v761_v48, %v450_v46 }
 0x25f   : > { %v599_v51 = vpop.f32.mrf.mxu1 }
 0x260   : > { %628 = vst.msk [vmem:[%s954_s15 + $0x70] sm:$0xff] %vm258_vm2, %v608_v50  ;;  %v600_v53 = vadd.f32 %v599_v51, %v448_v49 }
 0x261   : > { %v762_v54 = vpop.f32.mrf.mxu1 }
 0x262   : > { %626 = vst.msk [vmem:[%s954_s15 + $0x60] sm:$0xff] %vm258_vm2, %v600_v53  ;;  %v611_v56 = vadd.f32 %v762_v54, %v451_v52 }
 0x263   : > { %v602_v57 = vpop.f32.mrf.mxu1 }
 0x264   : > { %629 = vst.msk [vmem:[%s954_s15 + $0x78] sm:$0xff] %vm258_vm2, %v611_v56  ;;  %v603_v58 = vadd.f32 %v602_v57, %v449_v55 }
 0x266   : > { %627 = vst.msk [vmem:[%s954_s15 + $0x68] sm:$0xff] %vm258_vm2, %v603_v58 }
 0x267 PF: > { %s15_s20 = sadd.s32 1, %s828_s20   ;;  %s1045_s18 = smov %s824_s19 }
 0x268   : > { %p12_p5 = scmp.ge.s32.totalorder %s15_s20, 4   ;;  %s1046_s19 = smov %s1048_s21 }
 0x26a   :  { %14 = sbr.rel (!%p12_p5) target bundleno = 2 (0x2), region = 78 }

</bundles_post_ra>
